<compile_context>
chip_gen: v7x
topology: tpu7x:2x2x1
jax: 0.10.0
libtpu: 0.0.40
codegen_flags: <defaults>
</compile_context>

<pallas_src>
import math

import jax
import jax.numpy as jnp
from jax.experimental import pallas as pl
from jax.experimental.pallas import tpu as pltpu

HIDDEN = 256
LN_EPS = 1e-5
T_SCALE = 1.0 / math.sqrt(HIDDEN)   # pi = <curr, adj> / sqrt(256)


def _layernorm(x, gamma, beta):
    mu = jnp.mean(x, axis=-1, keepdims=True)
    var = jnp.mean(jnp.square(x - mu), axis=-1, keepdims=True)
    return (x - mu) * jax.lax.rsqrt(var + LN_EPS) * gamma + beta


def mulactor_kernel(c_ref, a_ref, wc_ref, wa_ref, bc_ref, ba_ref,
                    g_ref, be_ref, pi_ref):
    """One batch-tile.

    c_ref : (TB, D)    f32  curr rows of this tile.
    a_ref : (TB*N, D)  f32  adj rows of this tile (flattened).
    wc_ref, wa_ref : (D, HIDDEN) bf16 pre-transposed Linear weights.
    bc_ref, ba_ref : (1, HIDDEN) f32 biases.
    g_ref,  be_ref : (1, HIDDEN) f32 shared LayerNorm gamma / beta.
    pi_ref : (TB, N) f32 output block.
    """
    tb, n = pi_ref.shape

    # bf16 MXU matmuls with f32 accumulation; operands cast in VMEM so the
    # big tensors stream from HBM exactly once, in their native f32.
    hc = jnp.dot(c_ref[...].astype(jnp.bfloat16), wc_ref[...],
                 preferred_element_type=jnp.float32) + bc_ref[...]     # (TB, H)
    ha = jnp.dot(a_ref[...].astype(jnp.bfloat16), wa_ref[...],
                 preferred_element_type=jnp.float32) + ba_ref[...]     # (TB*N, H)

    gamma, beta = g_ref[...], be_ref[...]
    c = _layernorm(hc, gamma, beta)                                    # (TB, H)
    # Lane dim untouched -> cheap sublane-only split.
    a = _layernorm(ha, gamma, beta).reshape(tb, n, HIDDEN)             # (TB, N, H)

    # pi[i, j] = <c[i], a[i, j]> / sqrt(H): broadcast-mul (VPU) + lane reduce
    # (XLU).  Negligible at N=8.
    # TODO(synk): switch to a batched dot_general / lane-dense padded output
    # layout if N grows to O(128) (current output lane width is N < 128).
    pi = jnp.sum(c[:, None, :] * a, axis=-1) * T_SCALE                 # (TB, N)
    pi_ref[...] = pi.astype(pi_ref.dtype)


def _pick_batch_tile(b, n, d, budget_bytes=24 * 1024 * 1024):
    """Largest multiple-of-8 divisor of B whose per-step working set fits the
    VMEM budget (double-buffered f32 inputs + bf16 weights + f32 temps)."""
    if b % 8 != 0:
        return b                      # tiny / unaligned batch: single tile

    def step_bytes(tb):
        rows = tb * (n + 1)
        return (2 * rows * d * 4                 # 2x buffered f32 curr+adj tiles
                + 2 * 2 * d * HIDDEN * 2         # 2x buffered bf16 weights (x2)
                + 5 * rows * HIDDEN * 4          # f32 matmul / LN / product temps
                + 2 * tb * n * 4)                # 2x buffered output tile

    best = 8
    for tb in range(8, b + 1, 8):
        if b % tb == 0 and step_bytes(tb) <= budget_bytes:
            best = tb
    return best


def mulactor_forward(curr, adj, params):
    """curr: [B, D] f32, adj: [B, N, D] f32 -> (pi: [B, N] f32, None)."""
    B, D = curr.shape
    _, N, _ = adj.shape
    wc_t, bc, wa_t, ba, gamma, beta = params

    TB = _pick_batch_tile(B, N, D)
    nt = B // TB

    adj_flat = adj.reshape(B * N, D)             # row-major reshape: no copy
    wc = wc_t.astype(jnp.bfloat16)               # tiny; halves weight DMA
    wa = wa_t.astype(jnp.bfloat16)

    pi = pl.pallas_call(
        mulactor_kernel,
        out_shape=jax.ShapeDtypeStruct((B, N), jnp.float32),
        grid=(nt,),
        in_specs=[
            pl.BlockSpec((TB, D), lambda i: (i, 0)),          # curr tile
            pl.BlockSpec((TB * N, D), lambda i: (i, 0)),      # adj tile (flat)
            pl.BlockSpec((D, HIDDEN), lambda i: (0, 0)),      # Wc^T
            pl.BlockSpec((D, HIDDEN), lambda i: (0, 0)),      # Wa^T
            pl.BlockSpec((1, HIDDEN), lambda i: (0, 0)),      # bc
            pl.BlockSpec((1, HIDDEN), lambda i: (0, 0)),      # ba
            pl.BlockSpec((1, HIDDEN), lambda i: (0, 0)),      # LN gamma
            pl.BlockSpec((1, HIDDEN), lambda i: (0, 0)),      # LN beta
        ],
        out_specs=pl.BlockSpec((TB, N), lambda i: (i, 0)),
        compiler_params=pltpu.CompilerParams(
            dimension_semantics=("parallel",),
            vmem_limit_bytes=64 * 1024 * 1024,
        ),
    )(curr, adj_flat, wc, wa, bc, ba, gamma, beta)
    return pi, None


def make_params(key, input_size):
    """Deterministic synthetic parameters (Linear weights pre-transposed)."""
    k1, k2, k3, k4 = jax.random.split(key, 4)
    bound = 1.0 / math.sqrt(input_size)
    wc_t = jax.random.uniform(k1, (input_size, HIDDEN), jnp.float32, -bound, bound)
    bc = jax.random.uniform(k2, (1, HIDDEN), jnp.float32, -bound, bound)
    wa_t = jax.random.uniform(k3, (input_size, HIDDEN), jnp.float32, -bound, bound)
    ba = jax.random.uniform(k4, (1, HIDDEN), jnp.float32, -bound, bound)
    gamma = jnp.ones((1, HIDDEN), jnp.float32)   # nn.LayerNorm default init
    beta = jnp.zeros((1, HIDDEN), jnp.float32)
    return wc_t, bc, wa_t, ba, gamma, beta


def _reference(curr, adj, params, matmul_dtype=jnp.float32):
    """Pure-JAX reference mirroring the PyTorch forward (optionally with the
    same bf16 matmul-operand cast as the kernel)."""
    wc_t, bc, wa_t, ba, gamma, beta = params
    c = jnp.dot(curr.astype(matmul_dtype), wc_t.astype(matmul_dtype),
                preferred_element_type=jnp.float32) + bc
    c = _layernorm(c, gamma, beta)
    a = jnp.einsum('bnd,dh->bnh', adj.astype(matmul_dtype),
                   wa_t.astype(matmul_dtype),
                   preferred_element_type=jnp.float32) + ba
    a = _layernorm(a, gamma, beta)
    return jnp.einsum('bk,bnk->bn', c, a) * T_SCALE


if __name__ == "__main__":
    B, N, INPUT_SIZE = 8, 8, 32

    key = jax.random.PRNGKey(0)
    k_curr, k_adj, k_par = jax.random.split(key, 3)

    curr = jax.random.normal(k_curr, (B, INPUT_SIZE), jnp.float32)
    adj = jax.random.normal(k_adj, (B, N, INPUT_SIZE), jnp.float32)
    params = make_params(k_par, INPUT_SIZE)

    pi, _ = mulactor_forward(curr, adj, params)
    pi = jax.block_until_ready(pi)
    assert pi.shape == (B, N)

    # Tight check against a reference using the same bf16 matmul operands.
    ref_bf16 = _reference(curr, adj, params, matmul_dtype=jnp.bfloat16)
    assert jnp.allclose(pi, ref_bf16, atol=2e-3, rtol=2e-3), "mismatch vs bf16 ref"

    # Sanity check against the full-f32 PyTorch-equivalent forward
    # (tolerance widened only for the bf16 MXU-operand cast).
    ref_f32 = _reference(curr, adj, params, matmul_dtype=jnp.float32)
    assert jnp.allclose(pi, ref_f32, atol=5e-2, rtol=5e-2), "mismatch vs f32 ref"

    print("KERNEL_OK")
</pallas_src>

<mosaic_0001>
module attributes {stable_mosaic.version = 11 : i64} {
  func.func @mulactor_kernel(%arg0: i32, %arg1: memref<8x32xf32, #tpu.memory_space<vmem>>, %arg2: memref<64x32xf32, #tpu.memory_space<vmem>>, %arg3: memref<32x256xbf16, #tpu.memory_space<vmem>>, %arg4: memref<32x256xbf16, #tpu.memory_space<vmem>>, %arg5: memref<1x256xf32, #tpu.memory_space<vmem>>, %arg6: memref<1x256xf32, #tpu.memory_space<vmem>>, %arg7: memref<1x256xf32, #tpu.memory_space<vmem>>, %arg8: memref<1x256xf32, #tpu.memory_space<vmem>>, %arg9: memref<8x8xf32, #tpu.memory_space<vmem>>) attributes {dimension_semantics = [#tpu.dimension_semantics<parallel>], iteration_bounds = array<i64: 1>, scalar_prefetch = 0 : i64, scratch_operands = 0 : i64, tpu.core_type = #tpu.core_type<tc>, window_params = [{transform_indices = @transform_0, window_bounds = array<i64: 8, 32>}, {transform_indices = @transform_1, window_bounds = array<i64: 64, 32>}, {pipeline_mode = #tpu.pipeline_mode<synchronous>, transform_indices = @transform_2, window_bounds = array<i64: 32, 256>}, {pipeline_mode = #tpu.pipeline_mode<synchronous>, transform_indices = @transform_3, window_bounds = array<i64: 32, 256>}, {pipeline_mode = #tpu.pipeline_mode<synchronous>, transform_indices = @transform_4, window_bounds = array<i64: 1, 256>}, {pipeline_mode = #tpu.pipeline_mode<synchronous>, transform_indices = @transform_5, window_bounds = array<i64: 1, 256>}, {pipeline_mode = #tpu.pipeline_mode<synchronous>, transform_indices = @transform_6, window_bounds = array<i64: 1, 256>}, {pipeline_mode = #tpu.pipeline_mode<synchronous>, transform_indices = @transform_7, window_bounds = array<i64: 1, 256>}, {transform_indices = @transform_8, window_bounds = array<i64: 8, 8>}]} {
    %c0 = arith.constant 0 : index
    %c0_0 = arith.constant 0 : index
    %0 = vector.load %arg1[%c0, %c0_0] : memref<8x32xf32, #tpu.memory_space<vmem>>, vector<8x32xf32>
    %1 = arith.truncf %0 : vector<8x32xf32> to vector<8x32xbf16>
    %c0_1 = arith.constant 0 : index
    %c0_2 = arith.constant 0 : index
    %2 = vector.load %arg3[%c0_1, %c0_2] : memref<32x256xbf16, #tpu.memory_space<vmem>>, vector<32x256xbf16>
    %cst = arith.constant dense<0.000000e+00> : vector<8x256xf32>
    %3 = tpu.matmul %1, %2, %cst {dimension_numbers = #tpu.dot_dimension_numbers<[1], [0], [0], [1], [0, 0, 1, 1], [], []>} : vector<8x32xbf16>, vector<32x256xbf16>, vector<8x256xf32> -> vector<8x256xf32>
    %c0_3 = arith.constant 0 : index
    %c0_4 = arith.constant 0 : index
    %4 = vector.load %arg5[%c0_3, %c0_4] : memref<1x256xf32, #tpu.memory_space<vmem>>, vector<1x256xf32>
    %5 = vector.broadcast %4 : vector<1x256xf32> to vector<8x256xf32>
    %6 = arith.addf %3, %5 : vector<8x256xf32>
    %c0_5 = arith.constant 0 : index
    %c0_6 = arith.constant 0 : index
    %7 = vector.load %arg2[%c0_5, %c0_6] : memref<64x32xf32, #tpu.memory_space<vmem>>, vector<64x32xf32>
    %8 = arith.truncf %7 : vector<64x32xf32> to vector<64x32xbf16>
    %c0_7 = arith.constant 0 : index
    %c0_8 = arith.constant 0 : index
    %9 = vector.load %arg4[%c0_7, %c0_8] : memref<32x256xbf16, #tpu.memory_space<vmem>>, vector<32x256xbf16>
    %cst_9 = arith.constant dense<0.000000e+00> : vector<64x256xf32>
    %10 = tpu.matmul %8, %9, %cst_9 {dimension_numbers = #tpu.dot_dimension_numbers<[1], [0], [0], [1], [0, 0, 1, 1], [], []>} : vector<64x32xbf16>, vector<32x256xbf16>, vector<64x256xf32> -> vector<64x256xf32>
    %c0_10 = arith.constant 0 : index
    %c0_11 = arith.constant 0 : index
    %11 = vector.load %arg6[%c0_10, %c0_11] : memref<1x256xf32, #tpu.memory_space<vmem>>, vector<1x256xf32>
    %12 = vector.broadcast %11 : vector<1x256xf32> to vector<64x256xf32>
    %13 = arith.addf %10, %12 : vector<64x256xf32>
    %c0_12 = arith.constant 0 : index
    %c0_13 = arith.constant 0 : index
    %14 = vector.load %arg7[%c0_12, %c0_13] : memref<1x256xf32, #tpu.memory_space<vmem>>, vector<1x256xf32>
    %c0_14 = arith.constant 0 : index
    %c0_15 = arith.constant 0 : index
    %15 = vector.load %arg8[%c0_14, %c0_15] : memref<1x256xf32, #tpu.memory_space<vmem>>, vector<1x256xf32>
    %cst_16 = arith.constant dense<0.000000e+00> : vector<8xf32>
    %16 = vector.multi_reduction <add>, %6, %cst_16 [1] : vector<8x256xf32> to vector<8xf32>
    %17 = vector.shape_cast %16 : vector<8xf32> to vector<8x1xf32>
    %cst_17 = arith.constant 2.560000e+02 : f32
    %18 = vector.broadcast %cst_17 : f32 to vector<8x1xf32>
    %19 = arith.divf %17, %18 : vector<8x1xf32>
    %20 = vector.broadcast %19 : vector<8x1xf32> to vector<8x256xf32>
    %21 = arith.subf %6, %20 : vector<8x256xf32>
    %22 = arith.mulf %21, %21 : vector<8x256xf32>
    %cst_18 = arith.constant dense<0.000000e+00> : vector<8xf32>
    %23 = vector.multi_reduction <add>, %22, %cst_18 [1] : vector<8x256xf32> to vector<8xf32>
    %24 = vector.shape_cast %23 : vector<8xf32> to vector<8x1xf32>
    %cst_19 = arith.constant 2.560000e+02 : f32
    %25 = vector.broadcast %cst_19 : f32 to vector<8x1xf32>
    %26 = arith.divf %24, %25 : vector<8x1xf32>
    %27 = vector.broadcast %19 : vector<8x1xf32> to vector<8x256xf32>
    %28 = arith.subf %6, %27 : vector<8x256xf32>
    %cst_20 = arith.constant 9.99999974E-6 : f32
    %29 = vector.broadcast %cst_20 : f32 to vector<8x1xf32>
    %30 = arith.addf %26, %29 : vector<8x1xf32>
    %31 = math.rsqrt %30 : vector<8x1xf32>
    %32 = vector.broadcast %31 : vector<8x1xf32> to vector<8x256xf32>
    %33 = arith.mulf %28, %32 : vector<8x256xf32>
    %34 = vector.broadcast %14 : vector<1x256xf32> to vector<8x256xf32>
    %35 = arith.mulf %33, %34 : vector<8x256xf32>
    %36 = vector.broadcast %15 : vector<1x256xf32> to vector<8x256xf32>
    %37 = arith.addf %35, %36 : vector<8x256xf32>
    %cst_21 = arith.constant dense<0.000000e+00> : vector<64xf32>
    %38 = vector.multi_reduction <add>, %13, %cst_21 [1] : vector<64x256xf32> to vector<64xf32>
    %39 = vector.shape_cast %38 : vector<64xf32> to vector<64x1xf32>
    %cst_22 = arith.constant 2.560000e+02 : f32
    %40 = vector.broadcast %cst_22 : f32 to vector<64x1xf32>
    %41 = arith.divf %39, %40 : vector<64x1xf32>
    %42 = vector.broadcast %41 : vector<64x1xf32> to vector<64x256xf32>
    %43 = arith.subf %13, %42 : vector<64x256xf32>
    %44 = arith.mulf %43, %43 : vector<64x256xf32>
    %cst_23 = arith.constant dense<0.000000e+00> : vector<64xf32>
    %45 = vector.multi_reduction <add>, %44, %cst_23 [1] : vector<64x256xf32> to vector<64xf32>
    %46 = vector.shape_cast %45 : vector<64xf32> to vector<64x1xf32>
    %cst_24 = arith.constant 2.560000e+02 : f32
    %47 = vector.broadcast %cst_24 : f32 to vector<64x1xf32>
    %48 = arith.divf %46, %47 : vector<64x1xf32>
    %49 = vector.broadcast %41 : vector<64x1xf32> to vector<64x256xf32>
    %50 = arith.subf %13, %49 : vector<64x256xf32>
    %cst_25 = arith.constant 9.99999974E-6 : f32
    %51 = vector.broadcast %cst_25 : f32 to vector<64x1xf32>
    %52 = arith.addf %48, %51 : vector<64x1xf32>
    %53 = math.rsqrt %52 : vector<64x1xf32>
    %54 = vector.broadcast %53 : vector<64x1xf32> to vector<64x256xf32>
    %55 = arith.mulf %50, %54 : vector<64x256xf32>
    %56 = vector.broadcast %14 : vector<1x256xf32> to vector<64x256xf32>
    %57 = arith.mulf %55, %56 : vector<64x256xf32>
    %58 = vector.broadcast %15 : vector<1x256xf32> to vector<64x256xf32>
    %59 = arith.addf %57, %58 : vector<64x256xf32>
    %60 = vector.shape_cast %59 : vector<64x256xf32> to vector<8x8x256xf32>
    %61 = vector.shape_cast %37 : vector<8x256xf32> to vector<8x1x256xf32>
    %62 = vector.broadcast %61 : vector<8x1x256xf32> to vector<8x8x256xf32>
    %63 = arith.mulf %62, %60 : vector<8x8x256xf32>
    %cst_26 = arith.constant dense<0.000000e+00> : vector<8x8xf32>
    %64 = vector.multi_reduction <add>, %63, %cst_26 [2] : vector<8x8x256xf32> to vector<8x8xf32>
    %cst_27 = arith.constant 6.250000e-02 : f32
    %65 = vector.broadcast %cst_27 : f32 to vector<8x8xf32>
    %66 = arith.mulf %64, %65 : vector<8x8xf32>
    %c0_28 = arith.constant 0 : index
    %c0_29 = arith.constant 0 : index
    %67 = vector.load %arg9[%c0_28, %c0_29] : memref<8x8xf32, #tpu.memory_space<vmem>>, vector<8x8xf32>
    tpu.vector_store %arg9[%c0_28, %c0_29], %66 {strides = array<i32>} : memref<8x8xf32, #tpu.memory_space<vmem>>, vector<8x8xf32>,
    return
  }
  func.func @transform_0(%arg0: i32) -> (i32, i32) {
    %c0_i32 = arith.constant 0 : i32
    %c0_i32_0 = arith.constant 0 : i32
    return %arg0, %c0_i32 : i32, i32
  }
  func.func @transform_1(%arg0: i32) -> (i32, i32) {
    %c0_i32 = arith.constant 0 : i32
    %c0_i32_0 = arith.constant 0 : i32
    return %arg0, %c0_i32 : i32, i32
  }
  func.func @transform_2(%arg0: i32) -> (i32, i32) {
    %c0_i32 = arith.constant 0 : i32
    %c0_i32_0 = arith.constant 0 : i32
    %c0_i32_1 = arith.constant 0 : i32
    return %c0_i32, %c0_i32_0 : i32, i32
  }
  func.func @transform_3(%arg0: i32) -> (i32, i32) {
    %c0_i32 = arith.constant 0 : i32
    %c0_i32_0 = arith.constant 0 : i32
    %c0_i32_1 = arith.constant 0 : i32
    return %c0_i32, %c0_i32_0 : i32, i32
  }
  func.func @transform_4(%arg0: i32) -> (i32, i32) {
    %c0_i32 = arith.constant 0 : i32
    %c0_i32_0 = arith.constant 0 : i32
    %c0_i32_1 = arith.constant 0 : i32
    return %c0_i32, %c0_i32_0 : i32, i32
  }
  func.func @transform_5(%arg0: i32) -> (i32, i32) {
    %c0_i32 = arith.constant 0 : i32
    %c0_i32_0 = arith.constant 0 : i32
    %c0_i32_1 = arith.constant 0 : i32
    return %c0_i32, %c0_i32_0 : i32, i32
  }
  func.func @transform_6(%arg0: i32) -> (i32, i32) {
    %c0_i32 = arith.constant 0 : i32
    %c0_i32_0 = arith.constant 0 : i32
    %c0_i32_1 = arith.constant 0 : i32
    return %c0_i32, %c0_i32_0 : i32, i32
  }
  func.func @transform_7(%arg0: i32) -> (i32, i32) {
    %c0_i32 = arith.constant 0 : i32
    %c0_i32_0 = arith.constant 0 : i32
    %c0_i32_1 = arith.constant 0 : i32
    return %c0_i32, %c0_i32_0 : i32, i32
  }
  func.func @transform_8(%arg0: i32) -> (i32, i32) {
    %c0_i32 = arith.constant 0 : i32
    %c0_i32_0 = arith.constant 0 : i32
    return %arg0, %c0_i32 : i32, i32
  }
}

</mosaic_0001>

<bundles_post_ra>
// kernel: tpu_custom_call.1
= control target key start
LH: loop header
LB: loop body
LE: loop exit
PB: predicated region body
PF: predicated region fallthrough
CT: control target
= control target key end

     0   :  { %13 = vsyncpa [#allocation3], 0  ;;  %s1469_s0 = inlined_call_operand.hbm [shape: f32[8,32], index: 0, kind: input, shape index: {}]   ;;  %s1470_s1 = inlined_call_operand.hbm [shape: f32[64,32], index: 1, kind: input, shape index: {}]   ;;  %s1471_s2 = inlined_call_operand.hbm [shape: bf16[32,256], index: 2, kind: input, shape index: {}]   ;;  %s1472_s3 = inlined_call_operand.hbm [shape: bf16[32,256], index: 3, kind: input, shape index: {}]   ;;  %s1473_s4 = inlined_call_operand.hbm [shape: f32[1,256], index: 4, kind: input, shape index: {}]   ;;  %s1474_s5 = inlined_call_operand.hbm [shape: f32[1,256], index: 5, kind: input, shape index: {}]   ;;  %s1475_s6 = inlined_call_operand.hbm [shape: f32[1,256], index: 6, kind: input, shape index: {}]   ;;  %s1476_s7 = inlined_call_operand.hbm [shape: f32[1,256], index: 7, kind: input, shape index: {}]   ;;  %s1477_s8 = inlined_call_operand.hbm [shape: f32[8,8], index: 8, kind: output, shape index: {}]  }
   0x1   :  { %14 = vsyncpa [#allocation6], 0 }
   0x2   :  { %15 = vsyncpa [#allocation9], 0 }
   0x3   :  { %16 = vsyncpa [#allocation12], 0 }
   0x4   :  { %17 = vsyncpa [#allocation15], 0 }
   0x5   :  { %18 = vsyncpa [#allocation4], 0  ;;  %s1079_s27 = smov [#allocation5]   ;;  %s869_s9 = scalar_lea.hbm %s1470_s1, 1024 }
   0x6   :  { %s34_s28 = sshll.u32 %s1079_s27, 4  ;;  %p870_p0 = scmp.ne.s32.totalorder %s1470_s1, %s869_s9  ;;  %s35_s28 = int_to_ptr.vmem [resolvable:$true] %s34_s28 }
   0x7   :  { %p873_p1 = scmp.lt.u32.totalorder %s869_s9, %s1470_s1 }
   0x9   :  { %p875_p2 = pnand %p873_p1, %p870_p0 }
   0xb   :  { %878 = shalt.err (!%p875_p2)
}
   0xc   :  { %s879_s14 = scalar_lea.vmem %s35_s28, 1024  ;;  %p884_p4 = scmp.lt.s32.totalorder %s35_s28, %s35_s28 }
   0xd   :  { %p880_p3 = scmp.ne.s32.totalorder %s35_s28, %s879_s14  ;;  %p885_p5 = scmp.lt.s32.totalorder %s879_s14, %s879_s14 }
   0xf   :  { %p886_p6 = por %p885_p5, %p884_p4 }
  0x11   :  { %p887_p7 = pnand %p886_p6, %p880_p3 }
  0x13   :  { %890 = shalt.err (!%p887_p7)
}
  0x14   :  { %s1080_s15 = smov 128   ;;  %s1081_s16 = smov 8  }
  0x15   :  { %40 = dma.hbm_to_vmem [thread:$0]  %s1470_s1, 1024, %s35_s28, [#allocation6], %s1080_s15, %s1080_s15, %s1081_s16  }
  0x16   :  { %s1082_s19 = smov [#allocation8]   ;;  %s1083_s21 = smov [#allocation11]  }
  0x17   :  { %s58_s20 = sshll.u32 %s1082_s19, 4  ;;  %s81_s22 = sshll.u32 %s1083_s21, 4  ;;  %s59_s20 = int_to_ptr.vmem [resolvable:$true] %s58_s20  ;;  %s82_s22 = int_to_ptr.vmem [resolvable:$true] %s81_s22 }
  0x18   :  { %s891_s25 = scalar_lea.hbm %s1472_s3, 512 }
  0x19   :  { %p892_p8 = scmp.ne.s32.totalorder %s1472_s3, %s891_s25  ;;  %p895_p9 = scmp.lt.u32.totalorder %s891_s25, %s1472_s3 }
  0x1b   :  { %p897_p10 = pnand %p895_p9, %p892_p8 }
  0x1d   :  { %900 = shalt.err (!%p897_p10)
}
  0x1e   :  { %s901_s1 = scalar_lea.vmem %s59_s20, 512  ;;  %p906_p12 = scmp.lt.s32.totalorder %s59_s20, %s59_s20 }
  0x1f   :  { %p902_p11 = scmp.ne.s32.totalorder %s59_s20, %s901_s1  ;;  %p907_p13 = scmp.lt.s32.totalorder %s901_s1, %s901_s1 }
  0x21   :  { %p908_p0 = por %p907_p13, %p906_p12 }
  0x23   :  { %p909_p1 = pnand %p908_p0, %p902_p11 }
  0x25   :  { %912 = shalt.err (!%p909_p1)
}
  0x26   :  { %64 = dma.hbm_to_vmem [thread:$0]  %s1472_s3, 512, %s59_s20, [#allocation9], %s1080_s15, %s1080_s15, %s1081_s16  }
  0x27   :  { %s913_s12 = scalar_lea.hbm %s1474_s5, 32 }
  0x28   :  { %p914_p2 = scmp.ne.s32.totalorder %s1474_s5, %s913_s12  ;;  %p917_p3 = scmp.lt.u32.totalorder %s913_s12, %s1474_s5 }
  0x2a   :  { %p919_p4 = pnand %p917_p3, %p914_p2 }
  0x2c   :  { %922 = shalt.err (!%p919_p4)
}
  0x2d   :  { %s923_s19 = scalar_lea.vmem %s82_s22, 32  ;;  %p928_p6 = scmp.lt.s32.totalorder %s82_s22, %s82_s22 }
  0x2e   :  { %p924_p5 = scmp.ne.s32.totalorder %s82_s22, %s923_s19  ;;  %p929_p7 = scmp.lt.s32.totalorder %s923_s19, %s923_s19 }
  0x30   :  { %p930_p8 = por %p929_p7, %p928_p6 }
  0x32   :  { %p931_p9 = pnand %p930_p8, %p924_p5 }
  0x34   :  { %934 = shalt.err (!%p931_p9)
}
  0x35   :  { %84 = dma.hbm_to_vmem [thread:$0]  %s1474_s5, 32, %s82_s22, [#allocation12]  }
  0x36   :  { %s1084_s21 = smov [#allocation2]   ;;  %s1085_s24 = smov [#allocation7]  }
  0x37   :  { %s25_s23 = sshll.u32 %s1084_s21, 4  ;;  %s46_s25 = sshll.u32 %s1085_s24, 4  ;;  %s26_s23 = int_to_ptr.vmem [resolvable:$true] %s25_s23  ;;  %s47_s25 = int_to_ptr.vmem [resolvable:$true] %s46_s25 }
  0x38   :  { %s935_s29 = scalar_lea.hbm %s1469_s0, 128 }
  0x39   :  { %p936_p10 = scmp.ne.s32.totalorder %s1469_s0, %s935_s29  ;;  %p939_p11 = scmp.lt.u32.totalorder %s935_s29, %s1469_s0 }
  0x3b   :  { %p941_p12 = pnand %p939_p11, %p936_p10 }
  0x3d   :  { %944 = shalt.err (!%p941_p12)
}
  0x3e   :  { %s945_s5 = scalar_lea.vmem %s26_s23, 128  ;;  %p950_p0 = scmp.lt.s32.totalorder %s26_s23, %s26_s23 }
  0x3f   :  { %p946_p13 = scmp.ne.s32.totalorder %s26_s23, %s945_s5  ;;  %p951_p1 = scmp.lt.s32.totalorder %s945_s5, %s945_s5 }
  0x41   :  { %p952_p2 = por %p951_p1, %p950_p0 }
  0x43   :  { %p953_p3 = pnand %p952_p2, %p946_p13 }
  0x45   :  { %956 = shalt.err (!%p953_p3)
}
  0x46   :  { %28 = dma.hbm_to_vmem [thread:$0]  %s1469_s0, 128, %s26_s23, [#allocation3]  }
  0x47   :  { %s957_s13 = scalar_lea.hbm %s1471_s2, 512 }
  0x48   :  { %p958_p4 = scmp.ne.s32.totalorder %s1471_s2, %s957_s13  ;;  %p961_p5 = scmp.lt.u32.totalorder %s957_s13, %s1471_s2 }
  0x4a   :  { %p963_p6 = pnand %p961_p5, %p958_p4 }
  0x4c   :  { %966 = shalt.err (!%p963_p6)
}
  0x4d   :  { %s967_s3 = scalar_lea.vmem %s47_s25, 512  ;;  %p972_p8 = scmp.lt.s32.totalorder %s47_s25, %s47_s25 }
  0x4e   :  { %p968_p7 = scmp.ne.s32.totalorder %s47_s25, %s967_s3  ;;  %p973_p9 = scmp.lt.s32.totalorder %s967_s3, %s967_s3 }
  0x50   :  { %p974_p10 = por %p973_p9, %p972_p8 }
  0x52   :  { %p975_p11 = pnand %p974_p10, %p968_p7 }
  0x54   :  { %978 = shalt.err (!%p975_p11)
}
  0x55   :  { %52 = dma.hbm_to_vmem [thread:$0]  %s1471_s2, 512, %s47_s25, [#allocation6], %s1080_s15, %s1080_s15, %s1081_s16  }
  0x56   :  { %s1086_s21 = smov [#allocation10]   ;;  %s1087_s24 = smov [#allocation13]  }
  0x57   :  { %s71_s23 = sshll.u32 %s1086_s21, 4  ;;  %s91_s26 = sshll.u32 %s1087_s24, 4  ;;  %s72_s23 = int_to_ptr.vmem [resolvable:$true] %s71_s23  ;;  %s92_s26 = int_to_ptr.vmem [resolvable:$true] %s91_s26 }
  0x58   :  { %s979_s30 = scalar_lea.hbm %s1473_s4, 32 }
  0x59   :  { %p980_p12 = scmp.ne.s32.totalorder %s1473_s4, %s979_s30  ;;  %p983_p13 = scmp.lt.u32.totalorder %s979_s30, %s1473_s4 }
  0x5b   :  { %p985_p0 = pnand %p983_p13, %p980_p12 }
  0x5d   :  { %988 = shalt.err (!%p985_p0)
}
  0x5e   :  { %s989_s2 = scalar_lea.vmem %s72_s23, 32  ;;  %p994_p2 = scmp.lt.s32.totalorder %s72_s23, %s72_s23 }
  0x5f   :  { %p990_p1 = scmp.ne.s32.totalorder %s72_s23, %s989_s2  ;;  %p995_p3 = scmp.lt.s32.totalorder %s989_s2, %s989_s2 }
  0x61   :  { %p996_p4 = por %p995_p3, %p994_p2 }
  0x63   :  { %p997_p5 = pnand %p996_p4, %p990_p1 }
  0x65   :  { %1000 = shalt.err (!%p997_p5)
}
  0x66   :  { %74 = dma.hbm_to_vmem [thread:$0]  %s1473_s4, 32, %s72_s23, [#allocation9]  }
  0x67   :  { %s1001_s10 = scalar_lea.hbm %s1475_s6, 32 }
  0x68   :  { %p1002_p6 = scmp.ne.s32.totalorder %s1475_s6, %s1001_s10  ;;  %p1005_p7 = scmp.lt.u32.totalorder %s1001_s10, %s1475_s6 }
  0x6a   :  { %p1007_p8 = pnand %p1005_p7, %p1002_p6 }
  0x6c   :  { %1010 = shalt.err (!%p1007_p8)
}
  0x6d   :  { %s1011_s17 = scalar_lea.vmem %s92_s26, 32  ;;  %p1016_p10 = scmp.lt.s32.totalorder %s92_s26, %s92_s26 }
  0x6e   :  { %p1012_p9 = scmp.ne.s32.totalorder %s92_s26, %s1011_s17  ;;  %p1017_p11 = scmp.lt.s32.totalorder %s1011_s17, %s1011_s17 }
  0x70   :  { %p1018_p12 = por %p1017_p11, %p1016_p10 }
  0x72   :  { %p1019_p13 = pnand %p1018_p12, %p1012_p9 }
  0x74   :  { %1022 = shalt.err (!%p1019_p13)
}
  0x75   :  { %94 = dma.hbm_to_vmem [thread:$0]  %s1475_s6, 32, %s92_s26, [#allocation12]  }
  0x76   :  { %s1088_s19 = smov [#allocation14]   ;;  %s1023_s21 = scalar_lea.hbm %s1476_s7, 32 }
  0x77   :  { %s101_s3 = sshll.u32 %s1088_s19, 4  ;;  %p1024_p0 = scmp.ne.s32.totalorder %s1476_s7, %s1023_s21  ;;  %s102_s3 = int_to_ptr.vmem [resolvable:$true] %s101_s3 }
  0x78   :  { %p1027_p1 = scmp.lt.u32.totalorder %s1023_s21, %s1476_s7 }
  0x7a   :  { %p1029_p2 = pnand %p1027_p1, %p1024_p0 }
  0x7c   :  { %1032 = shalt.err (!%p1029_p2)
}
  0x7d   :  { %s1033_s30 = scalar_lea.vmem %s102_s3, 32  ;;  %p1038_p4 = scmp.lt.s32.totalorder %s102_s3, %s102_s3 }
  0x7e   :  { %p1034_p3 = scmp.ne.s32.totalorder %s102_s3, %s1033_s30  ;;  %p1039_p5 = scmp.lt.s32.totalorder %s1033_s30, %s1033_s30 }
  0x80   :  { %p1040_p6 = por %p1039_p5, %p1038_p4 }
  0x82   :  { %p1041_p7 = pnand %p1040_p6, %p1034_p3 }
  0x84   :  { %1044 = shalt.err (!%p1041_p7)
}
  0x85   :  { %104 = dma.hbm_to_vmem [thread:$0]  %s1476_s7, 32, %s102_s3, [#allocation15]  }
  0x86   :  { %1067 = dma.done.wait [#allocation3], 128  }
  0x87   :  { %1068 = vsyncadd [#allocation3], 4294967168 }
  0x88   :  { %1069 = dma.done.wait [#allocation6], 1536  }
  0x89   :  { %1070 = vsyncadd [#allocation6], 4294965760 }
  0x8a   :  { %1071 = dma.done.wait [#allocation9], 544  }
  0x8b   :  { %1072 = vsyncadd [#allocation9], 4294966752 }
  0x8c   :  { %1073 = dma.done.wait [#allocation12], 64  }
  0x8d   :  { %1074 = vsyncadd [#allocation12], 4294967232 }
  0x8e   :  { %1075 = dma.done.wait [#allocation15], 32  }
  0x8f   :  { %1076 = vsyncadd [#allocation15], 4294967264  ;;  %v1089_v0 = vmov 0   ;;  %v839_v1 = vld [vmem:[#allocation7 + $0x4] ss:$8 sps:$4 sm:$0xff]   ;;  %v130_v9 = vld [vmem:[#allocation2] sm:$0xff]  ;;  %v138_v23 = vlaneseq }
  0x90   :  { %204 = vmatprep.mubr.bf16.mxu0 %v1089_v0  ;;  %315 = vmatprep.mubr.bf16.mxu1 %v1089_v0  ;;  %v841_v2 = vld [vmem:[#allocation8 + $0x4] ss:$8 sps:$4 sm:$0xff]   ;;  %v843_v3 = vld [vmem:[#allocation7] ss:$8 sps:$4 sm:$0xff]   ;;  %v845_v5 = vld [vmem:[#allocation7 + $0x14] ss:$8 sps:$4 sm:$0xff]   ;;  %v131_v12 = vpack.c.bf16 %v130_v9, %v130_v9 }
  0x91   :  { %172 = vmatprep.subr.bf16.mxu0 %v839_v1  ;;  %v844_v4 = vld [vmem:[#allocation8] ss:$8 sps:$4 sm:$0xff]   ;;  %822 = vmatprep.subr.bf16.mxu1 %v841_v2  ;;  %v847_v6 = vld [vmem:[#allocation8 + $0x14] ss:$8 sps:$4 sm:$0xff]   ;;  %v849_v7 = vld [vmem:[#allocation7 + $0x10] ss:$8 sps:$4 sm:$0xff]  }
  0x92   :  { %173 = vmatpush1.bf16.msra.mxu0 %v843_v3  ;;  %824 = vmatpush1.bf16.msra.mxu1 %v844_v4  ;;  %v850_v8 = vld [vmem:[#allocation8 + $0x10] ss:$8 sps:$4 sm:$0xff]   ;;  %vm168_vm0 = vcmask 261120   ;;  %v213_v14 = vld [vmem:[#allocation5] sm:$0xff]  ;;  %v214_v15 = vld [vmem:[#allocation5 + $0x8] sm:$0xff]  ;;  %v1248_v24 = vshrl.u32 %v138_v23, 7 }
  0x93   :  { %174 = vmatprep.subr.bf16.mxu0 %v845_v5  ;;  %v215_v10 = vld [vmem:[#allocation5 + $0x10] sm:$0xff]  ;;  %823 = vmatprep.subr.bf16.mxu1 %v847_v6  ;;  %v216_v11 = vld [vmem:[#allocation5 + $0x18] sm:$0xff]  ;;  %v217_v16 = vld [vmem:[#allocation5 + $0x20] sm:$0xff]  ;;  %v221_v18 = vpack.c.bf16 %v214_v15, %v213_v14  ;;  %vm773_vm1 = vcmask 1041409   ;;  %vm775_vm2 = vcmask 1042434   ;;  %vm777_vm3 = vcmask 1043459  }
  0x94   :  { %v222_v13 = vpack.c.bf16 %v216_v11, %v215_v10  ;;  %v218_v17 = vld [vmem:[#allocation5 + $0x28] sm:$0xff]  ;;  %v219_v20 = vld [vmem:[#allocation5 + $0x30] sm:$0xff]  ;;  %v220_v21 = vld [vmem:[#allocation5 + $0x38] sm:$0xff]  ;;  %v1251_v25 = vsub.s32 0, %v1248_v24  ;;  %v1254_v28 = vsub.s32 1, %v1248_v24  ;;  %vm779_vm4 = vcmask 1044484  }
  0x95   :  { %v223_v19 = vpack.c.bf16 %v218_v17, %v217_v16  ;;  %v224_v22 = vpack.c.bf16 %v220_v21, %v219_v20  ;;  %v136_v26 = vld [vmem:[#allocation10] sm:$0x3]  ;;  %v229_v27 = vld [vmem:[#allocation11] sm:$0x3]  ;;  %vm781_vm5 = vcmask 1045509   ;;  %vm783_vm6 = vcmask 1046534  }
  0x96   :  { %175 = vmatpush1.bf16.msra.mxu0 %v849_v7  ;;  %825 = vmatpush1.bf16.msra.mxu1 %v850_v8  ;;  %v141_v29 = vrot.slane %v136_v26, %v1251_v25  ;;  %v234_v30 = vrot.slane %v229_v27, %v1251_v25  ;;  %v145_v31 = vrot.slane %v136_v26, %v1254_v28  ;;  %s1091_s7 = smov [#allocation16]   ;;  %vm785_vm7 = vcmask 1047559  }
  0x97   :  { %273 = vmatprep.subr.bf16.mxu0 %v841_v2  ;;  %v238_v32 = vrot.slane %v229_v27, %v1254_v28  ;;  %s796_s1 = sshll.u32 %s1091_s7, 4  ;;  %vm788_vm8 = vcmask 64512   ;;  %s797_s1 = int_to_ptr.vmem [resolvable:$true] %s796_s1 }
  0x98   :  { %s1045_s28 = scalar_lea.vmem %s797_s1, 128  ;;  %p1050_p9 = scmp.lt.s32.totalorder %s797_s1, %s797_s1 }
  0x99   :  { %813 = vmatmul.mubr.msk.bf16.vlgmr.msra.gmra.mrb[0].mxu0 %vm168_vm0, %v131_v12  ;;  %819 = vmatmul.mubr.msk.bf16.vlgmr.msra.gmra.mrb[0].mxu1 %vm168_vm0, %v222_v13  ;;  %p1046_p8 = scmp.ne.s32.totalorder %s797_s1, %s1045_s28  ;;  %p1051_p10 = scmp.lt.s32.totalorder %s1045_s28, %s1045_s28 }
  0x9a   :  { %274 = vmatpush1.bf16.msra.mxu0 %v844_v4  ;;  %305 = vmatprep.mubr.bf16.mxu0 %v1089_v0 }
  0x9b   :  { %275 = vmatprep.subr.bf16.mxu0 %v847_v6  ;;  %325 = vmatprep.mubr.bf16.mxu1 %v1089_v0  ;;  %p1052_p11 = por %p1051_p10, %p1050_p9 }
  0x9d   :  { %p1053_p12 = pnand %p1052_p11, %p1046_p8 }
  0x9e   :  { %276 = vmatpush1.bf16.msra.mxu0 %v850_v8 }
  0xa1   :  { %818 = vmatmul.mubr.msk.bf16.vlgmr.msra.gmra.mrb[4].mxu0 %vm168_vm0, %v221_v18  ;;  %820 = vmatmul.mubr.msk.bf16.gmra.mrb[4].mxu1 %vm168_vm0, %v223_v19 }
  0xa2   :  { %335 = vmatprep.mubr.bf16.mxu1 %v1089_v0 }
  0xa9   :  { %821 = vmatmul.mubr.msk.bf16.gmra.mrb[8].mxu1 %vm168_vm0, %v224_v22 }
 0x16c   :  { %v206_v33 = vpop.f32.mrb[0].mxu0  ;;  %v317_v34 = vpop.f32.mrb[0].mxu1 }
 0x16d   :  { %v207_v35 = vadd.f32 %v206_v33, %v141_v29  ;;  %v318_v36 = vadd.f32 %v317_v34, %v234_v30  ;;  %v208_v37 = vpop.f32.mrb[1].mxu0  ;;  %v319_v38 = vpop.f32.mrb[1].mxu1 }
 0x16e   :  { %v209_v39 = vadd.f32 %v208_v37, %v145_v31  ;;  %v320_v40 = vadd.f32 %v319_v38, %v238_v32  ;;  %v210_v41 = vpop.f32.mrb[2].mxu0  ;;  %v321_v42 = vpop.f32.mrb[2].mxu1 }
 0x16f   :  { %v211_v43 = vpop.f32.mrb[3].mxu0  ;;  %v322_v44 = vadd.f32 %v321_v42, %v234_v30  ;;  %v323_v45 = vpop.f32.mrb[3].mxu1 }
 0x170   :  { %v324_v46 = vadd.f32 %v323_v45, %v238_v32  ;;  %v397_v47 = vadd.f32 %v320_v40, %v318_v36  ;;  %v348_v48 = vadd.f32 %v209_v39, %v207_v35 }
 0x172   :  { %398 = vadd.xlane.f32.xlu1 %v397_v47  ;;  %349 = vadd.xlane.f32.xlu0 %v348_v48  ;;  %v400_v49 = vadd.f32 %v324_v46, %v322_v44 }
 0x174   :  { %v307_v50 = vpop.f32.mrb[4].mxu0  ;;  %v327_v51 = vpop.f32.mrb[4].mxu1 }
 0x175   :  { %v308_v52 = vadd.f32 %v307_v50, %v234_v30  ;;  %v309_v53 = vpop.f32.mrb[5].mxu0  ;;  %v329_v54 = vpop.f32.mrb[5].mxu1  ;;  %v1262_v1 = vadd.f32 %v327_v51, %v234_v30 }
 0x176   :  { %v310_v55 = vadd.f32 %v309_v53, %v238_v32  ;;  %v311_v56 = vpop.f32.mrb[6].mxu0  ;;  %401 = vadd.xlane.f32.xlu0 %v400_v49  ;;  %v331_v57 = vpop.f32.mrb[6].mxu1  ;;  %v1264_v2 = vadd.f32 %v329_v54, %v238_v32 }
 0x177   :  { %v312_v58 = vadd.f32 %v311_v56, %v234_v30  ;;  %v313_v59 = vpop.f32.mrb[7].mxu0  ;;  %v1260_v60 = vadd.f32 %v331_v57, %v234_v30  ;;  %v333_v61 = vpop.f32.mrb[7].mxu1 }
 0x178   :  { %v314_v62 = vadd.f32 %v313_v59, %v238_v32  ;;  %v334_v63 = vadd.f32 %v333_v61, %v238_v32  ;;  %v391_v0 = vadd.f32 %v310_v55, %v308_v52  ;;  %v403_v10 = vadd.f32 %v1264_v2, %v1262_v1 }
 0x17a   :  { %392 = vadd.xlane.f32.xlu0 %v391_v0  ;;  %v394_v3 = vadd.f32 %v314_v62, %v312_v58  ;;  %v406_v4 = vadd.f32 %v334_v63, %v1260_v60 }
 0x17c   :  { %v337_v5 = vpop.f32.mrb[8].mxu1  ;;  %395 = vadd.xlane.f32.xlu1 %v394_v3 }
 0x17d   :  { %v1267_v6 = vadd.f32 %v337_v5, %v234_v30  ;;  %v339_v7 = vpop.f32.mrb[9].mxu1 }
 0x17e   :  { %v1269_v8 = vadd.f32 %v339_v7, %v238_v32  ;;  %v341_v9 = vpop.f32.mrb[10].mxu1  ;;  %407 = vadd.xlane.f32.xlu0 %v406_v4 }
 0x17f   :  { %v1273_v11 = vadd.f32 %v341_v9, %v234_v30  ;;  %v343_v12 = vpop.f32.mrb[11].mxu1 }
 0x180   :  { %v1275_v13 = vadd.f32 %v343_v12, %v238_v32  ;;  %404 = vadd.xlane.f32.xlu1 %v403_v10  ;;  %v409_v14 = vadd.f32 %v1269_v8, %v1267_v6 }
 0x182   :  { %v412_v15 = vadd.f32 %v1275_v13, %v1273_v11 }
 0x184   :  { %410 = vadd.xlane.f32.xlu1 %v409_v14  ;;  %413 = vadd.xlane.f32.xlu0 %v412_v15 }
 0x1ff   :  { %v399_v16 = vpop.xlane.xlu1 %398  ;;  %v350_v17 = vpop.xlane.xlu0 %349 }
 0x200   :  { %v417_v18 = vmul.f32 0.00390625, %v399_v16  ;;  %v352_v19 = vmul.f32 0.00390625, %v350_v17 }
 0x202   :  { %v1281_v20 = vsub.f32 %v318_v36, %v417_v18  ;;  %v1283_v21 = vsub.f32 %v320_v40, %v417_v18  ;;  %v1285_v22 = vsub.f32 %v207_v35, %v352_v19  ;;  %v1287_v26 = vsub.f32 %v209_v39, %v352_v19 }
 0x203   :  { %v402_v27 = vpop.xlane.xlu0 %401 }
 0x204   :  { %v418_v29 = vmul.f32 0.00390625, %v402_v27  ;;  %v443_v30 = vmul.f32 %v1281_v20, %v1281_v20  ;;  %v444_v31 = vmul.f32 %v1283_v21, %v1283_v21  ;;  %v355_v32 = vmul.f32 %v1285_v22, %v1285_v22 }
 0x205   :  { %v356_v33 = vmul.f32 %v1287_v26, %v1287_v26 }
 0x206   :  { %v1297_v34 = vsub.f32 %v322_v44, %v418_v29  ;;  %v1299_v35 = vsub.f32 %v324_v46, %v418_v29  ;;  %v461_v36 = vadd.f32 %v444_v31, %v443_v30 }
 0x207   :  { %v393_v37 = vpop.xlane.xlu0 %392  ;;  %v357_v38 = vadd.f32 %v356_v33, %v355_v32 }
 0x208   :  { %v415_v39 = vmul.f32 0.00390625, %v393_v37  ;;  %462 = vadd.xlane.f32.xlu0 %v461_v36  ;;  %v445_v40 = vmul.f32 %v1297_v34, %v1297_v34  ;;  %v446_v41 = vmul.f32 %v1299_v35, %v1299_v35 }
 0x209   :  { %358 = vadd.xlane.f32.xlu1 %v357_v38  ;;  %v396_v42 = vpop.xlane.xlu1 %395 }
 0x20a   :  { %v1305_v43 = vsub.f32 %v308_v52, %v415_v39  ;;  %v1307_v45 = vsub.f32 %v310_v55, %v415_v39  ;;  %v416_v44 = vmul.f32 0.00390625, %v396_v42  ;;  %v464_v46 = vadd.f32 %v446_v41, %v445_v40  ;;  %v346_v40 = vld [vmem:[#allocation13] sm:$0x3] }
 0x20b   :  { %v408_v47 = vpop.xlane.xlu0 %407  ;;  %v1090_v42 = vmov 1966171168  }
 0x20c   :  { %v1309_v48 = vsub.f32 %v312_v58, %v416_v44  ;;  %v1311_v49 = vsub.f32 %v314_v62, %v416_v44  ;;  %v420_v50 = vmul.f32 0.00390625, %v408_v47  ;;  %v439_v51 = vmul.f32 %v1305_v43, %v1305_v43 }
 0x20d   :  { %465 = vadd.xlane.f32.xlu1 %v464_v46  ;;  %v405_v53 = vpop.xlane.xlu1 %404  ;;  %v440_v54 = vmul.f32 %v1307_v45, %v1307_v45  ;;  %v556_v44 = vunpack.c.l.s4 %v1090_v42 }
 0x20e   :  { %v1318_v52 = vsub.f32 %v1260_v60, %v420_v50  ;;  %v1320_v55 = vsub.f32 %v334_v63, %v420_v50  ;;  %v419_v56 = vmul.f32 0.00390625, %v405_v53  ;;  %v441_v57 = vmul.f32 %v1309_v48, %v1309_v48  ;;  %v347_v50 = vld [vmem:[#allocation14] sm:$0x3] }
 0x20f   :  { %v455_v58 = vadd.f32 %v440_v54, %v439_v51  ;;  %v442_v59 = vmul.f32 %v1311_v49, %v1311_v49  ;;  %v1361_v54 = vrot.slane %v346_v40, %v1251_v25 }
 0x210   :  { %v1327_v61 = vsub.f32 %v1262_v1, %v419_v56  ;;  %v1330_v62 = vsub.f32 %v1264_v2, %v419_v56  ;;  %v449_v63 = vmul.f32 %v1318_v52, %v1318_v52  ;;  %v450_v4 = vmul.f32 %v1320_v55, %v1320_v55 }
 0x211   :  { %456 = vadd.xlane.f32.xlu0 %v455_v58  ;;  %v411_v0 = vpop.xlane.xlu1 %410  ;;  %v414_v60 = vpop.xlane.xlu0 %413  ;;  %v458_v3 = vadd.f32 %v442_v59, %v441_v57  ;;  %v1364_v56 = vrot.slane %v346_v40, %v1254_v28  ;;  %v1367_v59 = vrot.slane %v347_v50, %v1251_v25 }
 0x212   :  { %v421_v5 = vmul.f32 0.00390625, %v411_v0  ;;  %v422_v7 = vmul.f32 0.00390625, %v414_v60  ;;  %v447_v9 = vmul.f32 %v1327_v61, %v1327_v61  ;;  %v448_v1 = vmul.f32 %v1330_v62, %v1330_v62 }
 0x213   :  { %459 = vadd.xlane.f32.xlu1 %v458_v3  ;;  %v470_v16 = vadd.f32 %v450_v4, %v449_v63  ;;  %v557_v0 = vunpack.c.0.s8 %v556_v44 }
 0x214   :  { %v1341_v2 = vsub.f32 %v1267_v6, %v421_v5  ;;  %v1344_v10 = vsub.f32 %v1269_v8, %v421_v5  ;;  %v1347_v12 = vsub.f32 %v1273_v11, %v422_v7  ;;  %v1350_v14 = vsub.f32 %v1275_v13, %v422_v7 }
 0x215   :  { %v467_v15 = vadd.f32 %v448_v1, %v447_v9  ;;  %v1373_v9 = vrot.slane %v347_v50, %v1254_v28 }
 0x216   :  { %v451_v17 = vmul.f32 %v1341_v2, %v1341_v2  ;;  %v452_v18 = vmul.f32 %v1344_v10, %v1344_v10  ;;  %v453_v6 = vmul.f32 %v1347_v12, %v1347_v12  ;;  %v454_v8 = vmul.f32 %v1350_v14, %v1350_v14 }
 0x217   :  { %468 = vadd.xlane.f32.xlu0 %v467_v15  ;;  %471 = vadd.xlane.f32.xlu1 %v470_v16 }
 0x218   :  { %v473_v11 = vadd.f32 %v452_v18, %v451_v17  ;;  %v476_v19 = vadd.f32 %v454_v8, %v453_v6 }
 0x21b   :  { %474 = vadd.xlane.f32.xlu0 %v473_v11  ;;  %477 = vadd.xlane.f32.xlu1 %v476_v19  ;;  %v560_v11 = vsub.s32 %v557_v0, %v1248_v24 }
 0x295   :  { %v463_v13 = vpop.xlane.xlu0 %462 }
 0x296   :  { %v359_v27 = vpop.xlane.xlu1 %358  ;;  %v481_v29 = vmul.f32 0.00390625, %v463_v13 }
 0x297   :  { %v360_v30 = vmul.f32 0.00390625, %v359_v27 }
 0x298   :  { %v489_v31 = vadd.f32 1e-05, %v481_v29 }
 0x299   :  { %v361_v32 = vadd.f32 1e-05, %v360_v30 }
 0x29a   :  { %851 = vrsqrt.f32 %v489_v31  ;;  %v466_v33 = vpop.xlane.xlu1 %465 }
 0x29b   :  { %853 = vrsqrt.f32 %v361_v32  ;;  %v482_v36 = vmul.f32 0.00390625, %v466_v33 }
 0x29d   :  { %v490_v37 = vadd.f32 1e-05, %v482_v36 }
 0x29e   :  { %v457_v38 = vpop.xlane.xlu0 %456 }
 0x29f   :  { %855 = vrsqrt.f32 %v490_v37  ;;  %v479_v39 = vmul.f32 0.00390625, %v457_v38 }
 0x2a0   :  { %v460_v41 = vpop.xlane.xlu1 %459 }
 0x2a1   :  { %v487_v46 = vadd.f32 1e-05, %v479_v39  ;;  %v480_v47 = vmul.f32 0.00390625, %v460_v41 }
 0x2a3   :  { %857 = vrsqrt.f32 %v487_v46  ;;  %v488_v51 = vadd.f32 1e-05, %v480_v47 }
 0x2a4   :  { %v852_v53 = vpop.eup %851  ;;  %v472_v57 = vpop.xlane.xlu1 %471 }
 0x2a5   :  { %v469_v58 = vpop.xlane.xlu0 %468  ;;  %v854_v60 = vpop.eup %853  ;;  %859 = vrsqrt.f32 %v488_v51  ;;  %v484_v3 = vmul.f32 0.00390625, %v472_v57  ;;  %v507_v4 = vmul.f32 %v852_v53, %v1281_v20  ;;  %v508_v1 = vmul.f32 %v852_v53, %v1283_v21 }
 0x2a6   :  { %v483_v63 = vmul.f32 0.00390625, %v469_v58  ;;  %v363_v5 = vmul.f32 %v854_v60, %v1285_v22  ;;  %v364_v7 = vmul.f32 %v854_v60, %v1287_v26 }
 0x2a7   :  { %v492_v15 = vadd.f32 1e-05, %v484_v3  ;;  %v523_v20 = vmul.f32 %v507_v4, %v1361_v54  ;;  %v524_v13 = vmul.f32 %v508_v1, %v1364_v56 }
 0x2a8   :  { %v491_v16 = vadd.f32 1e-05, %v483_v63  ;;  %v376_v17 = vmul.f32 %v1361_v54, %v363_v5  ;;  %v377_v18 = vmul.f32 %v1364_v56, %v364_v7  ;;  %v478_v6 = vpop.xlane.xlu1 %477 }
 0x2a9   :  { %v475_v8 = vpop.xlane.xlu0 %474  ;;  %v856_v22 = vpop.eup %855  ;;  %861 = vrsqrt.f32 %v492_v15  ;;  %v486_v26 = vmul.f32 0.00390625, %v478_v6  ;;  %v1388_v40 = vadd.f32 %v523_v20, %v1367_v59  ;;  %v1391_v41 = vadd.f32 %v524_v13, %v1373_v9 }
 0x2aa   :  { %v485_v19 = vmul.f32 0.00390625, %v475_v8  ;;  %863 = vrsqrt.f32 %v491_v16  ;;  %v389_v21 = vadd.f32 %v1367_v59, %v376_v17  ;;  %v390_v27 = vadd.f32 %v1373_v9, %v377_v18 }
 0x2ab   :  { %v509_v29 = vmul.f32 %v856_v22, %v1297_v34  ;;  %v494_v30 = vadd.f32 1e-05, %v486_v26  ;;  %v510_v32 = vmul.f32 %v856_v22, %v1299_v35 }
 0x2ac   :  { %v493_v31 = vadd.f32 1e-05, %v485_v19  ;;  %v553_v33 = vcombine.low %v389_v21, %v390_v27  ;;  %v554_v36 = vcombine.high %v389_v21, %v390_v27 }
 0x2ad   :  { %v525_v37 = vmul.f32 %v509_v29, %v1361_v54  ;;  %v858_v38 = vpop.eup %857  ;;  %v526_v39 = vmul.f32 %v510_v32, %v1364_v56  ;;  %865 = vrsqrt.f32 %v494_v30 }
 0x2ae   :  { %v503_v34 = vmul.f32 %v858_v38, %v1305_v43  ;;  %v504_v42 = vmul.f32 %v858_v38, %v1307_v45  ;;  %v561_v44 = vrot.slane %v553_v33, %v560_v11  ;;  %867 = vrsqrt.f32 %v493_v31 }
 0x2af   :  { %v860_v35 = vpop.eup %859  ;;  %v568_v46 = vrot.slane %v554_v36, %v560_v11  ;;  %v541_v47 = vadd.f32 %v525_v37, %v1367_v59  ;;  %v542_v50 = vadd.f32 %v526_v39, %v1373_v9 }
 0x2b0   :  { %v519_v51 = vmul.f32 %v503_v34, %v1361_v54  ;;  %v520_v53 = vmul.f32 %v504_v42, %v1364_v56  ;;  %v577_v57 = vrot.slane %v561_v44, %v560_v11  ;;  %v505_v58 = vmul.f32 %v860_v35, %v1309_v48 }
 0x2b1   :  { %v506_v0 = vmul.f32 %v860_v35, %v1311_v49  ;;  %v569_v43 = vcombine.high %v561_v44, %v561_v44  ;;  %v570_v60 = vcombine.high %v568_v46, %v568_v46  ;;  %v1401_v45 = vrot.slane %v568_v46, %v560_v11 }
 0x2b2   :  { %v535_v3 = vadd.f32 %v519_v51, %v1367_v59  ;;  %v536_v63 = vadd.f32 %v520_v53, %v1373_v9  ;;  %v606_v4 = vrot.slane %v577_v57, %v1251_v25  ;;  %v610_v5 = vrot.slane %v577_v57, %v1254_v28 }
 0x2b3   :  { %v862_v7 = vpop.eup %861  ;;  %v521_v1 = vmul.f32 %v505_v58, %v1361_v54  ;;  %v522_v15 = vmul.f32 %v506_v0, %v1364_v56  ;;  %v591_v48 = vrot.slane %v569_v43, %v560_v11  ;;  %v598_v16 = vrot.slane %v570_v60, %v560_v11 }
 0x2b4   :  { %v864_v49 = vpop.eup %863  ;;  %v683_v17 = vmul.f32 %v606_v4, %v535_v3  ;;  %v684_v18 = vmul.f32 %v610_v5, %v536_v63  ;;  %v513_v6 = vmul.f32 %v862_v7, %v1318_v52  ;;  %v514_v8 = vmul.f32 %v862_v7, %v1320_v55 }
 0x2b5   :  { %v537_v20 = vadd.f32 %v521_v1, %v1367_v59  ;;  %v538_v22 = vadd.f32 %v522_v15, %v1373_v9  ;;  %v614_v26 = vrot.slane %v591_v48, %v1251_v25  ;;  %v618_v19 = vrot.slane %v591_v48, %v1254_v28 }
 0x2b6   :  { %v699_v13 = vadd.f32 %v684_v18, %v683_v17  ;;  %v529_v21 = vmul.f32 %v513_v6, %v1361_v54  ;;  %v530_v11 = vmul.f32 %v514_v8, %v1364_v56  ;;  %v646_v27 = vrot.slane %v598_v16, %v1251_v25 }
 0x2b7   :  { %v685_v29 = vmul.f32 %v614_v26, %v537_v20  ;;  %v686_v30 = vmul.f32 %v618_v19, %v538_v22  ;;  %v650_v52 = vrot.slane %v598_v16, %v1254_v28  ;;  %v511_v55 = vmul.f32 %v864_v49, %v1327_v61  ;;  %v866_v31 = vpop.eup %865 }
 0x2b8   :  { %700 = vadd.xlane.f32.xlu0 %v699_v13  ;;  %v545_v32 = vadd.f32 %v529_v21, %v1367_v59  ;;  %v546_v33 = vadd.f32 %v530_v11, %v1373_v9  ;;  %v512_v36 = vmul.f32 %v864_v49, %v1330_v62  ;;  %v638_v37 = vrot.slane %v1401_v45, %v1251_v25  ;;  %v868_v38 = vpop.eup %867 }
 0x2b9   :  { %v702_v39 = vadd.f32 %v686_v30, %v685_v29  ;;  %v527_v34 = vmul.f32 %v511_v55, %v1361_v54  ;;  %v642_v42 = vrot.slane %v1401_v45, %v1254_v28  ;;  %v601_v44 = vcombine.high %v591_v48, %v591_v48 }
 0x2ba   :  { %v693_v61 = vmul.f32 %v646_v27, %v545_v32  ;;  %v694_v35 = vmul.f32 %v650_v52, %v546_v33  ;;  %v528_v46 = vmul.f32 %v512_v36, %v1364_v56  ;;  %v599_v51 = vcombine.high %v577_v57, %v577_v57 }
 0x2bb   :  { %703 = vadd.xlane.f32.xlu1 %v702_v39  ;;  %v543_v53 = vadd.f32 %v527_v34, %v1367_v59  ;;  %v630_v62 = vrot.slane %v601_v44, %v1251_v25  ;;  %v634_v58 = vrot.slane %v601_v44, %v1254_v28  ;;  %v517_v0 = vmul.f32 %v866_v31, %v1347_v12 }
 0x2bc   :  { %v714_v43 = vadd.f32 %v694_v35, %v693_v61  ;;  %v544_v60 = vadd.f32 %v528_v46, %v1373_v9  ;;  %v622_v3 = vrot.slane %v599_v51, %v1251_v25  ;;  %v626_v63 = vrot.slane %v599_v51, %v1254_v28 }
 0x2bd   :  { %v691_v4 = vmul.f32 %v638_v37, %v543_v53  ;;  %v689_v5 = vmul.f32 %v630_v62, %v541_v47  ;;  %v690_v7 = vmul.f32 %v634_v58, %v542_v50  ;;  %v518_v57 = vmul.f32 %v866_v31, %v1350_v14 }
 0x2be   :  { %v692_v1 = vmul.f32 %v642_v42, %v544_v60  ;;  %v687_v15 = vmul.f32 %v622_v3, %v1388_v40  ;;  %v533_v48 = vmul.f32 %v517_v0, %v1361_v54  ;;  %v688_v12 = vmul.f32 %v626_v63, %v1391_v41 }
 0x2bf   :  { %715 = vadd.xlane.f32.xlu1 %v714_v43  ;;  %v534_v49 = vmul.f32 %v518_v57, %v1364_v56  ;;  %v602_v17 = vcombine.high %v598_v16, %v598_v16  ;;  %v515_v18 = vmul.f32 %v868_v38, %v1341_v2  ;;  %v708_v8 = vadd.f32 %v690_v7, %v689_v5 }
 0x2c0   :  { %v711_v6 = vadd.f32 %v692_v1, %v691_v4  ;;  %v549_v47 = vadd.f32 %v533_v48, %v1367_v59  ;;  %v516_v50 = vmul.f32 %v868_v38, %v1344_v10  ;;  %v600_v2 = vcombine.high %v1401_v45, %v1401_v45 }
 0x2c1   :  { %v550_v14 = vadd.f32 %v534_v49, %v1373_v9  ;;  %v662_v40 = vrot.slane %v602_v17, %v1251_v25  ;;  %v666_v20 = vrot.slane %v602_v17, %v1254_v28  ;;  %v531_v22 = vmul.f32 %v515_v18, %v1361_v54 }
 0x2c2   :  { %712 = vadd.xlane.f32.xlu0 %v711_v6  ;;  %v532_v41 = vmul.f32 %v516_v50, %v1364_v56  ;;  %v705_v10 = vadd.f32 %v688_v12, %v687_v15  ;;  %v654_v21 = vrot.slane %v600_v2, %v1251_v25  ;;  %v658_v11 = vrot.slane %v600_v2, %v1254_v28 }
 0x2c3   :  { %709 = vadd.xlane.f32.xlu1 %v708_v8  ;;  %v697_v16 = vmul.f32 %v662_v40, %v549_v47  ;;  %v698_v26 = vmul.f32 %v666_v20, %v550_v14  ;;  %v547_v19 = vadd.f32 %v531_v22, %v1367_v59  ;;  %v740_v55 = vand.u32 127, %v138_v23 }
 0x2c4   :  { %v548_v13 = vadd.f32 %v532_v41, %v1373_v9 }
 0x2c5   :  { %v720_v27 = vadd.f32 %v698_v26, %v697_v16  ;;  %v695_v54 = vmul.f32 %v654_v21, %v547_v19  ;;  %v743_v9 = vsub.s32 %v740_v55, %v1248_v24 }
 0x2c6   :  { %706 = vadd.xlane.f32.xlu0 %v705_v10  ;;  %v696_v29 = vmul.f32 %v658_v11, %v548_v13 }
 0x2c7   :  { %721 = vadd.xlane.f32.xlu1 %v720_v27 }
 0x2c8   :  { %v717_v56 = vadd.f32 %v696_v29, %v695_v54 }
 0x2ca   :  { %718 = vadd.xlane.f32.xlu0 %v717_v56 }
 0x345   :  { %v701_v30 = vpop.xlane.xlu0 %700 }
 0x346   :  { %v723_v25 = vmul.f32 0.0625, %v701_v30 }
 0x348   :  { %v704_v45 = vpop.xlane.xlu1 %703  ;;  %v744_v34 = vrot.slane %v723_v25, %v743_v9 }
 0x349   :  { %v724_v59 = vmul.f32 0.0625, %v704_v45 }
 0x34b   :  { %v748_v28 = vrot.slane %v724_v59, %v743_v9 }
 0x34c   :  { %v716_v52 = vpop.xlane.xlu1 %715 }
 0x34d   :  { %v728_v42 = vmul.f32 0.0625, %v716_v52  ;;  %v774_v35 = vsel %vm773_vm1, %v748_v28, %v744_v34 }
 0x34f   :  { %v713_v31 = vpop.xlane.xlu0 %712  ;;  %v764_v62 = vrot.slane %v728_v42, %v743_v9 }
 0x350   :  { %v710_v32 = vpop.xlane.xlu1 %709  ;;  %v727_v37 = vmul.f32 0.0625, %v713_v31 }
 0x351   :  { %v726_v33 = vmul.f32 0.0625, %v710_v32 }
 0x352   :  { %v760_v51 = vrot.slane %v727_v37, %v743_v9 }
 0x353   :  { %v707_v36 = vpop.xlane.xlu0 %706  ;;  %v756_v44 = vrot.slane %v726_v33, %v743_v9 }
 0x354   :  { %v725_v38 = vmul.f32 0.0625, %v707_v36  ;;  %v722_v39 = vpop.xlane.xlu1 %721 }
 0x355   :  { %v730_v61 = vmul.f32 0.0625, %v722_v39 }
 0x356   :  { %v752_v23 = vrot.slane %v725_v38, %v743_v9 }
 0x357   :  { %v719_v46 = vpop.xlane.xlu0 %718  ;;  %v772_v0 = vrot.slane %v730_v61, %v743_v9 }
 0x358   :  { %v776_v24 = vsel %vm775_vm2, %v752_v23, %v774_v35  ;;  %v729_v53 = vmul.f32 0.0625, %v719_v46 }
 0x359   :  { %v778_v58 = vsel %vm777_vm3, %v756_v44, %v776_v24 }
 0x35a   :  { %v768_v43 = vrot.slane %v729_v53, %v743_v9  ;;  %v780_v60 = vsel %vm779_vm4, %v760_v51, %v778_v58 }
 0x35b   :  { %v782_v3 = vsel %vm781_vm5, %v764_v62, %v780_v60 }
 0x35c   :  { %v784_v63 = vsel %vm783_vm6, %v768_v43, %v782_v3 }
 0x35d   :  { %v786_v4 = vsel %vm785_vm7, %v772_v0, %v784_v63 }
 0x35e   :  { %789 = vst.msk [vmem:[#allocation16] sm:$0xff] %vm788_vm8, %v786_v4 }
 0x35f   :  { %1056 = shalt.err (!%p1053_p12)
}
 0x360   :  { %s1057_s2 = scalar_lea.hbm %s1477_s8, 128 }
 0x361   :  { %p1058_p13 = scmp.ne.s32.totalorder %s1477_s8, %s1057_s2  ;;  %p1061_p0 = scmp.lt.u32.totalorder %s1057_s2, %s1477_s8 }
 0x363   :  { %p1063_p1 = pnand %p1061_p0, %p1058_p13 }
 0x365   :  { %1066 = shalt.err (!%p1063_p1)
}
 0x366   :  { %799 = dma.vmem_to_hbm [thread:$0]  %s797_s1, 128, %s1477_s8, [#allocation4]  }
 0x367   :  { %1077 = dma.done.wait [#allocation4], 128  }
 0x368   :  { %1078 = vsyncadd [#allocation4], 4294967168 }
 0x369   :  { %803 = vsyncpa [#allocation3], 1 }
 0x36a   :  { %804 = vsyncpa [#allocation6], 1 }
 0x36b   :  { %805 = vsyncpa [#allocation9], 1 }
 0x36c   :  { %806 = vsyncpa [#allocation12], 1 }
 0x36d   :  { %807 = vsyncpa [#allocation15], 1 }
 0x36e   :  { %808 = vsyncpa [#allocation4], 1 }

</bundles_post_ra>
